<compile_context>
chip_gen: v7x
topology: tpu7x:2x2x1
jax: 0.10.0
libtpu: 0.0.40
codegen_flags: <defaults>
</compile_context>

<pallas_src>
import functools
import math

import jax
import jax.numpy as jnp
from jax.experimental import pallas as pl
from jax.experimental.pallas import tpu as pltpu


def _round_up(x, m):
    return ((x + m - 1) // m) * m


def _cdiv(a, b):
    return (a + b - 1) // b


def fc_decoder_kernel(hs_ref, w1_ref, b1_ref, w2_ref, b2_ref, out_ref):
    """One batch tile of  sigmoid(x @ W1 + b1) @ W2 + b2  (dropout = eval no-op).

    hs_ref : (input_num, TB, dimf)  f32    batch tile of the encoder output
    w1_ref : (input_num, dimf, Hp)  bf16   layer-1 weight, folded over input_num
    b1_ref : (1, Hp)                f32
    w2_ref : (Hp, C)                bf16   (C = num_class, unpadded)
    b2_ref : (1, C)                 f32
    out_ref: (TB, C)                f32
    """
    input_num = hs_ref.shape[0]

    # output_layer1: Linear(dimf*input_num -> H).  The PyTorch permute(1,0,2)
    # + flatten(1) becomes a short static-unrolled sum of MXU matmuls; the
    # bf16 cast of hs happens here in VMEM (inputs arrive as f32 from HBM).
    acc = jnp.dot(hs_ref[0].astype(jnp.bfloat16), w1_ref[0],
                  preferred_element_type=jnp.float32)
    for s in range(1, input_num):  # input_num is small & static -> unrolled
        acc += jnp.dot(hs_ref[s].astype(jnp.bfloat16), w1_ref[s],
                       preferred_element_type=jnp.float32)
    h = acc + b1_ref[...]

    # activation1: exact Sigmoid (exp on the EUP, exact divide).
    h = 1.0 / (1.0 + jnp.exp(-h))

    # dropout1: identity in eval mode.
    # TODO(synk): training-mode dropout (pltpu.prng_seed + prng_random_bits mask).

    # output_layer3: Linear(H -> num_class); narrow-C output so only the real
    # columns are written back to HBM.
    out = jnp.dot(h.astype(w2_ref.dtype), w2_ref[...],
                  preferred_element_type=jnp.float32)
    out_ref[...] = (out + b2_ref[...]).astype(out_ref.dtype)


def prepare_params(w1, b1, w2, b2, input_num, lane=128):
    """One-time reshape / pad / cast of the Linear params.

    w1: (dimf*input_num, H)  (== torch weight.T), b1: (H,), w2: (H, C), b2: (C,)
    """
    d_in, h = w1.shape
    dimf = d_in // input_num
    c = w2.shape[1]
    hp = _round_up(max(h, lane), lane)

    # Fold the flatten(1) ordering: column s*dimf + d  ->  (s, d).
    w1_3d = w1.reshape(input_num, dimf, h)
    w1_3d = jnp.pad(w1_3d, ((0, 0), (0, 0), (0, hp - h))).astype(jnp.bfloat16)
    b1_p = jnp.pad(b1, (0, hp - h)).reshape(1, hp).astype(jnp.float32)
    # Padded hidden units: W1 columns / b1 entries beyond H are exactly zero,
    # so their sigmoid(0)=0.5 is annihilated by the zero rows padded onto W2.
    w2_p = jnp.pad(w2, ((0, hp - h), (0, 0))).astype(jnp.bfloat16)
    b2_p = b2.reshape(1, c).astype(jnp.float32)
    return w1_3d, b1_p, w2_p, b2_p


def fc_decoder_forward(hs, params, num_class, *, tb_max=1024):
    """hs: (input_num, batch, dim_feedforward)  ->  (batch, num_class)."""
    w1_3d, b1_p, w2_p, b2_p = params
    input_num, batch, dimf = hs.shape
    hp = w1_3d.shape[2]

    # Batch tile: near-full last tile (avoid up-to-a-tile padding waste) and
    # >= 2 grid steps whenever batch allows, so v7x's two TensorCores both get
    # work via the "parallel" grid axis.  tb is a multiple of 8 sublanes.
    num_tiles = _cdiv(batch, tb_max)
    if num_tiles == 1 and batch > 8:
        num_tiles = 2
    tb = _round_up(_cdiv(batch, num_tiles), 8)
    grid = _cdiv(batch, tb)
    b_pad = grid * tb

    x = hs  # f32 straight through; bf16 cast happens inside the kernel (VMEM)
    if b_pad != batch:
        x = jnp.pad(x, ((0, 0), (0, b_pad - batch), (0, 0)))

    out = pl.pallas_call(
        fc_decoder_kernel,
        out_shape=jax.ShapeDtypeStruct((b_pad, num_class), jnp.float32),
        grid_spec=pltpu.PrefetchScalarGridSpec(
            num_scalar_prefetch=0,
            grid=(grid,),
            in_specs=[
                # batch-tiled input; weights/biases resident via constant maps
                pl.BlockSpec((input_num, tb, dimf), lambda i: (0, i, 0)),
                pl.BlockSpec((input_num, dimf, hp), lambda i: (0, 0, 0)),
                pl.BlockSpec((1, hp), lambda i: (0, 0)),
                pl.BlockSpec((hp, num_class), lambda i: (0, 0)),
                pl.BlockSpec((1, num_class), lambda i: (0, 0)),
            ],
            out_specs=pl.BlockSpec((tb, num_class), lambda i: (i, 0)),
        ),
        compiler_params=pltpu.CompilerParams(
            dimension_semantics=("parallel",),   # shards across v7x's 2 TCs
        ),
    )(x, w1_3d, b1_p, w2_p, b2_p)

    return out[:batch] if b_pad != batch else out


def init_params(key, dim_feedforward, num_class, input_num):
    """nn.Linear-style U(-1/sqrt(fan_in), 1/sqrt(fan_in)) init, stored as (in, out)."""
    d_in = dim_feedforward * input_num
    hidden = dim_feedforward // input_num
    k1, k2, k3, k4 = jax.random.split(key, 4)

    bound1 = 1.0 / math.sqrt(d_in)
    w1 = jax.random.uniform(k1, (d_in, hidden), jnp.float32, -bound1, bound1)
    b1 = jax.random.uniform(k2, (hidden,), jnp.float32, -bound1, bound1)

    bound2 = 1.0 / math.sqrt(hidden)
    w2 = jax.random.uniform(k3, (hidden, num_class), jnp.float32, -bound2, bound2)
    b2 = jax.random.uniform(k4, (num_class,), jnp.float32, -bound2, bound2)
    return w1, b1, w2, b2


def reference_forward(hs, w1, b1, w2, b2):
    """Pure-JAX reference of the PyTorch forward (eval mode), bf16 matmul inputs."""
    input_num, batch, dimf = hs.shape
    x = jnp.transpose(hs, (1, 0, 2)).reshape(batch, input_num * dimf)
    h = jnp.dot(x.astype(jnp.bfloat16), w1.astype(jnp.bfloat16),
                preferred_element_type=jnp.float32) + b1
    h = jax.nn.sigmoid(h)
    out = jnp.dot(h.astype(jnp.bfloat16), w2.astype(jnp.bfloat16),
                  preferred_element_type=jnp.float32) + b2
    return out


if __name__ == "__main__":
    # Small shapes consistent with the module: input_num=3, dim_feedforward=96,
    # hidden = 96 // 3 = 32, num_class = 16, batch = 8.
    input_num = 3
    dim_feedforward = 96
    num_class = 16
    batch = 8

    key = jax.random.PRNGKey(0)
    k_hs, k_params = jax.random.split(key)

    hs = jax.random.normal(k_hs, (input_num, batch, dim_feedforward), jnp.float32)
    w1, b1, w2, b2 = init_params(k_params, dim_feedforward, num_class, input_num)

    params = prepare_params(w1, b1, w2, b2, input_num)
    fwd = jax.jit(functools.partial(fc_decoder_forward, num_class=num_class))
    out = jax.block_until_ready(fwd(hs, params))

    ref = reference_forward(hs, w1, b1, w2, b2)
    assert out.shape == (batch, num_class)
    assert jnp.allclose(out, ref, atol=2e-2, rtol=2e-2), (
        f"mismatch vs reference: max abs err {jnp.max(jnp.abs(out - ref))}")

    print("KERNEL_OK")
</pallas_src>

<mosaic_0001>
module attributes {stable_mosaic.version = 11 : i64} {
  func.func @fc_decoder_kernel(%arg0: i32, %arg1: memref<3x8x96xf32, #tpu.memory_space<vmem>>, %arg2: memref<3x96x128xbf16, #tpu.memory_space<vmem>>, %arg3: memref<1x128xf32, #tpu.memory_space<vmem>>, %arg4: memref<128x16xbf16, #tpu.memory_space<vmem>>, %arg5: memref<1x16xf32, #tpu.memory_space<vmem>>, %arg6: memref<8x16xf32, #tpu.memory_space<vmem>>) attributes {dimension_semantics = [#tpu.dimension_semantics<parallel>], iteration_bounds = array<i64: 1>, scalar_prefetch = 0 : i64, scratch_operands = 0 : i64, tpu.core_type = #tpu.core_type<tc>, window_params = [{transform_indices = @transform_0, window_bounds = array<i64: 3, 8, 96>}, {pipeline_mode = #tpu.pipeline_mode<synchronous>, transform_indices = @transform_1, window_bounds = array<i64: 3, 96, 128>}, {pipeline_mode = #tpu.pipeline_mode<synchronous>, transform_indices = @transform_2, window_bounds = array<i64: 1, 128>}, {pipeline_mode = #tpu.pipeline_mode<synchronous>, transform_indices = @transform_3, window_bounds = array<i64: 128, 16>}, {pipeline_mode = #tpu.pipeline_mode<synchronous>, transform_indices = @transform_4, window_bounds = array<i64: 1, 16>}, {transform_indices = @transform_5, window_bounds = array<i64: 8, 16>}]} {
    %c0 = arith.constant 0 : index
    %c0_0 = arith.constant 0 : index
    %c0_1 = arith.constant 0 : index
    %0 = vector.load %arg1[%c0, %c0_0, %c0_1] : memref<3x8x96xf32, #tpu.memory_space<vmem>>, vector<1x8x96xf32>
    %1 = vector.shape_cast %0 : vector<1x8x96xf32> to vector<8x96xf32>
    %2 = arith.truncf %1 : vector<8x96xf32> to vector<8x96xbf16>
    %c0_2 = arith.constant 0 : index
    %c0_3 = arith.constant 0 : index
    %c0_4 = arith.constant 0 : index
    %3 = vector.load %arg2[%c0_2, %c0_3, %c0_4] : memref<3x96x128xbf16, #tpu.memory_space<vmem>>, vector<1x96x128xbf16>
    %4 = vector.shape_cast %3 : vector<1x96x128xbf16> to vector<96x128xbf16>
    %cst = arith.constant dense<0.000000e+00> : vector<8x128xf32>
    %5 = tpu.matmul %2, %4, %cst {dimension_numbers = #tpu.dot_dimension_numbers<[1], [0], [0], [1], [0, 0, 1, 1], [], []>} : vector<8x96xbf16>, vector<96x128xbf16>, vector<8x128xf32> -> vector<8x128xf32>
    %c1 = arith.constant 1 : index
    %c0_5 = arith.constant 0 : index
    %c0_6 = arith.constant 0 : index
    %6 = vector.load %arg1[%c1, %c0_5, %c0_6] : memref<3x8x96xf32, #tpu.memory_space<vmem>>, vector<1x8x96xf32>
    %7 = vector.shape_cast %6 : vector<1x8x96xf32> to vector<8x96xf32>
    %8 = arith.truncf %7 : vector<8x96xf32> to vector<8x96xbf16>
    %c1_7 = arith.constant 1 : index
    %c0_8 = arith.constant 0 : index
    %c0_9 = arith.constant 0 : index
    %9 = vector.load %arg2[%c1_7, %c0_8, %c0_9] : memref<3x96x128xbf16, #tpu.memory_space<vmem>>, vector<1x96x128xbf16>
    %10 = vector.shape_cast %9 : vector<1x96x128xbf16> to vector<96x128xbf16>
    %cst_10 = arith.constant dense<0.000000e+00> : vector<8x128xf32>
    %11 = tpu.matmul %8, %10, %cst_10 {dimension_numbers = #tpu.dot_dimension_numbers<[1], [0], [0], [1], [0, 0, 1, 1], [], []>} : vector<8x96xbf16>, vector<96x128xbf16>, vector<8x128xf32> -> vector<8x128xf32>
    %12 = arith.addf %5, %11 : vector<8x128xf32>
    %c2 = arith.constant 2 : index
    %c0_11 = arith.constant 0 : index
    %c0_12 = arith.constant 0 : index
    %13 = vector.load %arg1[%c2, %c0_11, %c0_12] : memref<3x8x96xf32, #tpu.memory_space<vmem>>, vector<1x8x96xf32>
    %14 = vector.shape_cast %13 : vector<1x8x96xf32> to vector<8x96xf32>
    %15 = arith.truncf %14 : vector<8x96xf32> to vector<8x96xbf16>
    %c2_13 = arith.constant 2 : index
    %c0_14 = arith.constant 0 : index
    %c0_15 = arith.constant 0 : index
    %16 = vector.load %arg2[%c2_13, %c0_14, %c0_15] : memref<3x96x128xbf16, #tpu.memory_space<vmem>>, vector<1x96x128xbf16>
    %17 = vector.shape_cast %16 : vector<1x96x128xbf16> to vector<96x128xbf16>
    %cst_16 = arith.constant dense<0.000000e+00> : vector<8x128xf32>
    %18 = tpu.matmul %15, %17, %cst_16 {dimension_numbers = #tpu.dot_dimension_numbers<[1], [0], [0], [1], [0, 0, 1, 1], [], []>} : vector<8x96xbf16>, vector<96x128xbf16>, vector<8x128xf32> -> vector<8x128xf32>
    %19 = arith.addf %12, %18 : vector<8x128xf32>
    %c0_17 = arith.constant 0 : index
    %c0_18 = arith.constant 0 : index
    %20 = vector.load %arg3[%c0_17, %c0_18] : memref<1x128xf32, #tpu.memory_space<vmem>>, vector<1x128xf32>
    %21 = vector.broadcast %20 : vector<1x128xf32> to vector<8x128xf32>
    %22 = arith.addf %19, %21 : vector<8x128xf32>
    %cst_19 = arith.constant 0.000000e+00 : f32
    %23 = vector.broadcast %cst_19 : f32 to vector<8x128xf32>
    %24 = arith.subf %23, %22 : vector<8x128xf32>
    %25 = math.exp %24 : vector<8x128xf32>
    %cst_20 = arith.constant 1.000000e+00 : f32
    %26 = vector.broadcast %cst_20 : f32 to vector<8x128xf32>
    %27 = arith.addf %26, %25 : vector<8x128xf32>
    %cst_21 = arith.constant 1.000000e+00 : f32
    %28 = vector.broadcast %cst_21 : f32 to vector<8x128xf32>
    %29 = arith.divf %28, %27 : vector<8x128xf32>
    %30 = arith.truncf %29 : vector<8x128xf32> to vector<8x128xbf16>
    %c0_22 = arith.constant 0 : index
    %c0_23 = arith.constant 0 : index
    %31 = vector.load %arg4[%c0_22, %c0_23] : memref<128x16xbf16, #tpu.memory_space<vmem>>, vector<128x16xbf16>
    %cst_24 = arith.constant dense<0.000000e+00> : vector<8x16xf32>
    %32 = tpu.matmul %30, %31, %cst_24 {dimension_numbers = #tpu.dot_dimension_numbers<[1], [0], [0], [1], [0, 0, 1, 1], [], []>} : vector<8x128xbf16>, vector<128x16xbf16>, vector<8x16xf32> -> vector<8x16xf32>
    %c0_25 = arith.constant 0 : index
    %c0_26 = arith.constant 0 : index
    %33 = vector.load %arg5[%c0_25, %c0_26] : memref<1x16xf32, #tpu.memory_space<vmem>>, vector<1x16xf32>
    %34 = vector.broadcast %33 : vector<1x16xf32> to vector<8x16xf32>
    %35 = arith.addf %32, %34 : vector<8x16xf32>
    %c0_27 = arith.constant 0 : index
    %c0_28 = arith.constant 0 : index
    %36 = vector.load %arg6[%c0_27, %c0_28] : memref<8x16xf32, #tpu.memory_space<vmem>>, vector<8x16xf32>
    tpu.vector_store %arg6[%c0_27, %c0_28], %35 {strides = array<i32>} : memref<8x16xf32, #tpu.memory_space<vmem>>, vector<8x16xf32>,
    return
  }
  func.func @transform_0(%arg0: i32) -> (i32, i32, i32) {
    %c0_i32 = arith.constant 0 : i32
    %c0_i32_0 = arith.constant 0 : i32
    %c0_i32_1 = arith.constant 0 : i32
    return %c0_i32, %arg0, %c0_i32_0 : i32, i32, i32
  }
  func.func @transform_1(%arg0: i32) -> (i32, i32, i32) {
    %c0_i32 = arith.constant 0 : i32
    %c0_i32_0 = arith.constant 0 : i32
    %c0_i32_1 = arith.constant 0 : i32
    %c0_i32_2 = arith.constant 0 : i32
    return %c0_i32, %c0_i32_0, %c0_i32_1 : i32, i32, i32
  }
  func.func @transform_2(%arg0: i32) -> (i32, i32) {
    %c0_i32 = arith.constant 0 : i32
    %c0_i32_0 = arith.constant 0 : i32
    %c0_i32_1 = arith.constant 0 : i32
    return %c0_i32, %c0_i32_0 : i32, i32
  }
  func.func @transform_3(%arg0: i32) -> (i32, i32) {
    %c0_i32 = arith.constant 0 : i32
    %c0_i32_0 = arith.constant 0 : i32
    %c0_i32_1 = arith.constant 0 : i32
    return %c0_i32, %c0_i32_0 : i32, i32
  }
  func.func @transform_4(%arg0: i32) -> (i32, i32) {
    %c0_i32 = arith.constant 0 : i32
    %c0_i32_0 = arith.constant 0 : i32
    %c0_i32_1 = arith.constant 0 : i32
    return %c0_i32, %c0_i32_0 : i32, i32
  }
  func.func @transform_5(%arg0: i32) -> (i32, i32) {
    %c0_i32 = arith.constant 0 : i32
    %c0_i32_0 = arith.constant 0 : i32
    return %arg0, %c0_i32 : i32, i32
  }
}

</mosaic_0001>

<bundles_post_ra>
// kernel: fc_decoder_forward.1
= control target key start
LH: loop header
LB: loop body
LE: loop exit
PB: predicated region body
PF: predicated region fallthrough
CT: control target
= control target key end

     0   :  { %10 = vsyncpa [#allocation3], 0  ;;  %s815_s0 = inlined_call_operand.vmem [shape: f32[3,8,96], index: 0, kind: input, shape index: {}]   ;;  %s816_s1 = inlined_call_operand.hbm [shape: bf16[3,96,128], index: 1, kind: input, shape index: {}]   ;;  %s817_s2 = inlined_call_operand.vmem [shape: f32[1,128], index: 2, kind: input, shape index: {}]   ;;  %s818_s3 = inlined_call_operand.vmem [shape: bf16[128,16], index: 3, kind: input, shape index: {}]   ;;  %s819_s4 = inlined_call_operand.vmem [shape: f32[1,16], index: 4, kind: input, shape index: {}]   ;;  %s820_s5 = inlined_call_operand.hbm [shape: f32[8,16], index: 5, kind: output, shape index: {}]  }
   0x1   :  { %11 = vsyncpa [#allocation4], 0  ;;  %s679_s18 = smov [#allocation2]   ;;  %s631_s22 = scalar_lea.hbm %s816_s1, 2304 }
   0x2   :  { %s19_s19 = sshll.u32 %s679_s18, 4  ;;  %p632_p0 = scmp.ne.s32.totalorder %s816_s1, %s631_s22  ;;  %s20_s19 = int_to_ptr.vmem [resolvable:$true] %s19_s19 }
   0x3   :  { %p635_p1 = scmp.lt.u32.totalorder %s631_s22, %s816_s1 }
   0x5   :  { %p637_p2 = pnand %p635_p1, %p632_p0 }
   0x7   :  { %640 = shalt.err (!%p637_p2)
}
   0x8   :  { %s641_s27 = scalar_lea.vmem %s20_s19, 2304  ;;  %p646_p4 = scmp.lt.s32.totalorder %s20_s19, %s20_s19 }
   0x9   :  { %p642_p3 = scmp.ne.s32.totalorder %s20_s19, %s641_s27  ;;  %p647_p5 = scmp.lt.s32.totalorder %s641_s27, %s641_s27 }
   0xb   :  { %p648_p6 = por %p647_p5, %p646_p4 }
   0xd   :  { %p649_p7 = pnand %p648_p6, %p642_p3 }
   0xf   :  { %652 = shalt.err (!%p649_p7)
}
  0x10   :  { %s680_s28 = smov 64   ;;  %s681_s29 = smov 4  }
  0x11   :  { %25 = dma.hbm_to_vmem [thread:$0]  %s816_s1, 2304, %s20_s19, [#allocation3], %s680_s28, %s680_s28, %s681_s29  }
  0x12   :  { %675 = dma.done.wait [#allocation3], 2304  }
  0x13   :  { %676 = vsyncadd [#allocation3], 4294964992  ;;  %v682_v0 = vmov 0.0   ;;  %vm683_vm0 = vmmov 0   ;;  %v601_v1 = vld [vmem:[#allocation2 + $0x30] sm:$0xff]   ;;  %v602_v2 = vld [vmem:[#allocation2] sm:$0xff]  }
  0x14   :  { %527 = vmatprep.subr.bf16.mxu0 %v682_v0  ;;  %543 = vmatprep.subr.bf16.mxu1 %v682_v0  ;;  %v603_v3 = vld [vmem:[#allocation2 + $0x38] sm:$0xff]   ;;  %v604_v4 = vld [vmem:[#allocation2 + $0x8] sm:$0xff]   ;;  %v605_v5 = vld [vmem:[#allocation2 + $0x40] sm:$0xff]   ;;  %vm102_vm1 = vcmask 785408   ;;  %s684_s30 = smov [#allocation5]   ;;  %vm447_vm2 = vcmask 130048  }
  0x15   :  { %539 = vmatprep.mubr.msk.bf16.mxu0 %vm683_vm0, %v682_v0  ;;  %555 = vmatprep.mubr.msk.bf16.mxu1 %vm683_vm0, %v682_v0  ;;  %v606_v6 = vld [vmem:[#allocation2 + $0x10] sm:$0xff]   ;;  %v607_v7 = vld [vmem:[#allocation2 + $0x48] sm:$0xff]   ;;  %v608_v8 = vld [vmem:[#allocation2 + $0x18] sm:$0xff]  }
  0x16   :  { %528 = vmatpush3.bf16.msra.mxu0 %v601_v1  ;;  %544 = vmatpush3.bf16.msra.mxu1 %v602_v2  ;;  %v609_v9 = vld [vmem:[#allocation2 + $0x50] sm:$0xff]   ;;  %v610_v10 = vld [vmem:[#allocation2 + $0x20] sm:$0xff]   ;;  %v611_v11 = vld [vmem:[#allocation2 + $0x58] sm:$0xff]  }
  0x17   :  { %529 = vmatprep.subr.bf16.mxu0 %v682_v0  ;;  %545 = vmatprep.subr.bf16.mxu1 %v682_v0  ;;  %v612_v12 = vld [vmem:[#allocation2 + $0x28] sm:$0xff]   ;;  %v36_v14 = vld [vmem:[%s815_s0] sm:$0xff]  ;;  %v615_v19 = vld [vmem:[#allocation2 + $0x70] sm:$0xff]  }
  0x18   :  { %v464_v13 = vld [vmem:[%s815_s0 + $0x8] sm:$0xff]  ;;  %v613_v15 = vld [vmem:[#allocation2 + $0x60] sm:$0xff]   ;;  %v37_v17 = vpack.c.bf16 %v36_v14, %v36_v14  ;;  %v616_v20 = vld [vmem:[#allocation2 + $0x78] sm:$0xff]  }
  0x19   :  { %v52_v16 = vpack.c.bf16 %v464_v13, %v464_v13  ;;  %v614_v18 = vld [vmem:[#allocation2 + $0x68] sm:$0xff]   ;;  %v617_v21 = vld [vmem:[#allocation2 + $0x80] sm:$0xff]   ;;  %v479_v23 = vld [vmem:[%s815_s0 + $0x10] sm:$0xff] }
  0x1a   :  { %530 = vmatpush3.bf16.msra.mxu0 %v603_v3  ;;  %546 = vmatpush3.bf16.msra.mxu1 %v604_v4  ;;  %v618_v22 = vld [vmem:[#allocation2 + $0x88] sm:$0xff]   ;;  %v227_v24 = vpack.c.bf16 %v479_v23, %v479_v23  ;;  %v619_v25 = vld [vmem:[%s818_s3] sm:$0xff]   ;;  %v621_v27 = vld [vmem:[%s818_s3 + $0x10] sm:$0xff]  }
  0x1b   :  { %531 = vmatprep.subr.bf16.mxu0 %v682_v0  ;;  %547 = vmatprep.subr.bf16.mxu1 %v682_v0  ;;  %v620_v26 = vld [vmem:[%s818_s3 + $0x8] sm:$0xff]   ;;  %v622_v28 = vld [vmem:[%s818_s3 + $0x18] sm:$0xff]   ;;  %v623_v29 = vld [vmem:[%s818_s3 + $0x20] sm:$0xff]  }
  0x1c   :  { %v624_v30 = vld [vmem:[%s818_s3 + $0x28] sm:$0xff]   ;;  %v625_v31 = vld [vmem:[%s818_s3 + $0x30] sm:$0xff]   ;;  %v626_v32 = vld [vmem:[%s818_s3 + $0x38] sm:$0xff]  }
  0x1d   :  { %v487_v43 = vld [vmem:[%s817_s2] ss:$0 sm:$0xff]  ;;  %s455_s2 = sshll.u32 %s684_s30, 4  ;;  %s456_s2 = int_to_ptr.vmem [resolvable:$true] %s455_s2 }
  0x1e   :  { %532 = vmatpush3.bf16.msra.mxu0 %v605_v5  ;;  %548 = vmatpush3.bf16.msra.mxu1 %v606_v6  ;;  %v488_v55 = vld [vmem:[%s819_s4] ss:$0 sm:$0xff]  ;;  %s653_s6 = scalar_lea.vmem %s456_s2, 128  ;;  %p658_p9 = scmp.lt.s32.totalorder %s456_s2, %s456_s2 }
  0x1f   :  { %533 = vmatprep.subr.bf16.mxu0 %v682_v0  ;;  %549 = vmatprep.subr.bf16.mxu1 %v682_v0  ;;  %p654_p8 = scmp.ne.s32.totalorder %s456_s2, %s653_s6  ;;  %p659_p10 = scmp.lt.s32.totalorder %s653_s6, %s653_s6 }
  0x21   :  { %p660_p11 = por %p659_p10, %p658_p9 }
  0x22   :  { %534 = vmatpush3.bf16.msra.mxu0 %v607_v7  ;;  %550 = vmatpush3.bf16.msra.mxu1 %v608_v8 }
  0x23   :  { %535 = vmatprep.subr.bf16.mxu0 %v682_v0  ;;  %551 = vmatprep.subr.bf16.mxu1 %v682_v0  ;;  %p661_p12 = pnand %p660_p11, %p654_p8 }
  0x26   :  { %536 = vmatpush3.bf16.msra.mxu0 %v609_v9  ;;  %552 = vmatpush3.bf16.msra.mxu1 %v610_v10 }
  0x27   :  { %537 = vmatprep.subr.bf16.mxu0 %v682_v0  ;;  %553 = vmatprep.subr.bf16.mxu1 %v682_v0 }
  0x2a   :  { %538 = vmatpush3.bf16.msra.mxu0 %v611_v11  ;;  %554 = vmatpush3.bf16.msra.mxu1 %v612_v12 }
  0x2b   :  { %559 = vmatprep.subr.bf16.mxu0 %v682_v0  ;;  %575 = vmatprep.subr.bf16.mxu1 %v682_v0 }
  0x2d   :  { %540 = vmatmul.mubr.msk.bf16.vlgmr.msra.gmra.mrb[0].mxu0 %vm102_vm1, %v52_v16  ;;  %556 = vmatmul.mubr.msk.bf16.vlgmr.msra.gmra.mrb[0].mxu1 %vm102_vm1, %v37_v17 }
  0x2e   :  { %560 = vmatpush3.bf16.msra.mxu0 %v613_v15  ;;  %571 = vmatprep.mubr.msk.bf16.mxu0 %vm683_vm0, %v682_v0 }
  0x2f   :  { %561 = vmatprep.subr.bf16.mxu0 %v682_v0  ;;  %591 = vmatprep.mubr.msk.bf16.mxu1 %vm683_vm0, %v682_v0 }
  0x30   :  { %576 = vmatpush3.bf16.msra.mxu1 %v619_v25 }
  0x31   :  { %577 = vmatprep.subr.bf16.mxu1 %v682_v0 }
  0x32   :  { %562 = vmatpush3.bf16.msra.mxu0 %v614_v18 }
  0x33   :  { %563 = vmatprep.subr.bf16.mxu0 %v682_v0 }
  0x34   :  { %578 = vmatpush3.bf16.msra.mxu1 %v620_v26 }
  0x35   :  { %579 = vmatprep.subr.bf16.mxu1 %v682_v0 }
  0x36   :  { %564 = vmatpush3.bf16.msra.mxu0 %v615_v19 }
  0x37   :  { %565 = vmatprep.subr.bf16.mxu0 %v682_v0 }
  0x38   :  { %580 = vmatpush3.bf16.msra.mxu1 %v621_v27 }
  0x39   :  { %581 = vmatprep.subr.bf16.mxu1 %v682_v0 }
  0x3a   :  { %566 = vmatpush3.bf16.msra.mxu0 %v616_v20 }
  0x3b   :  { %567 = vmatprep.subr.bf16.mxu0 %v682_v0 }
  0x3c   :  { %582 = vmatpush3.bf16.msra.mxu1 %v622_v28 }
  0x3d   :  { %583 = vmatprep.subr.bf16.mxu1 %v682_v0 }
  0x3e   :  { %568 = vmatpush3.bf16.msra.mxu0 %v617_v21 }
  0x3f   :  { %569 = vmatprep.subr.bf16.mxu0 %v682_v0 }
  0x40   :  { %584 = vmatpush3.bf16.msra.mxu1 %v623_v29 }
  0x41   :  { %585 = vmatprep.subr.bf16.mxu1 %v682_v0 }
  0x42   :  { %570 = vmatpush3.bf16.msra.mxu0 %v618_v22 }
  0x44   :  { %586 = vmatpush3.bf16.msra.mxu1 %v624_v30 }
  0x45   :  { %572 = vmatmul.mubr.msk.bf16.vlgmr.msra.gmra.mrb[4].mxu0 %vm102_vm1, %v227_v24  ;;  %587 = vmatprep.subr.bf16.mxu1 %v682_v0 }
  0x48   :  { %588 = vmatpush3.bf16.msra.mxu1 %v625_v31 }
  0x49   :  { %589 = vmatprep.subr.bf16.mxu1 %v682_v0 }
  0x4c   :  { %590 = vmatpush3.bf16.msra.mxu1 %v626_v32 }
 0x100   :  { %v140_v33 = vpop.f32.mrb[0].mxu0  ;;  %v219_v35 = vpop.f32.mrb[0].mxu1 }
 0x101   :  { %v541_v34 = vpop.f32.mrb[1].mxu0  ;;  %v220_v36 = vadd.f32 %v219_v35, %v140_v33  ;;  %v557_v38 = vpop.f32.mrb[1].mxu1 }
 0x102   :  { %v143_v37 = vpop.f32.mrb[2].mxu0  ;;  %v222_v40 = vpop.f32.mrb[2].mxu1 }
 0x103   :  { %v542_v39 = vpop.f32.mrb[3].mxu0  ;;  %v558_v41 = vpop.f32.mrb[3].mxu1 }
 0x118   :  { %v314_v42 = vpop.f32.mrb[4].mxu0 }
 0x119   :  { %v320_v44 = vadd.f32 %v314_v42, %v220_v36  ;;  %v573_v45 = vpop.f32.mrb[5].mxu0 }
 0x11a   :  { %v317_v46 = vpop.f32.mrb[6].mxu0 }
 0x11b   :  { %v328_v47 = vadd.f32 %v487_v43, %v320_v44  ;;  %v574_v48 = vpop.f32.mrb[7].mxu0 }
 0x11d   :  { %v329_v49 = vsub.f32 0.0, %v328_v47 }
 0x11f   :  { %v330_v50 = vmul.f32 1.442695, %v329_v49 }
 0x121   :  { %627 = vpow2.f32 %v330_v50 }
 0x12b   :  { %v628_v51 = vpop.eup %627 }
 0x12c   :  { %v332_v52 = vadd.f32 1.0, %v628_v51 }
 0x12e   :  { %629 = vrcp.f32 %v332_v52 }
 0x138   :  { %v630_v53 = vpop.eup %629 }
 0x139   :  { %v335_v54 = vpack.c.bf16 %v630_v53, %v630_v53 }
 0x13b   :  { %592 = vmatmul.mubr.bf16.vlgmr.msra.gmra.mrb[4].mxu1 %v335_v54 }
 0x20e   :  { %v441_v56 = vpop.f32.mrb[4].mxu1 }
 0x20f   :  { %v442_v57 = vadd.f32 %v488_v55, %v441_v56  ;;  %v593_v58 = vpop.f32.mrb[5].mxu1 }
 0x210   :  { %v444_v59 = vpop.f32.mrb[6].mxu1 }
 0x211   :  { %v594_v60 = vpop.f32.mrb[7].mxu1  ;;  %448 = vst.msk [vmem:[#allocation5] sm:$0xff] %vm447_vm2, %v442_v57 }
 0x212   :  { %664 = shalt.err (!%p661_p12)
}
 0x213   :  { %s665_s4 = scalar_lea.hbm %s820_s5, 128 }
 0x214   :  { %p666_p13 = scmp.ne.s32.totalorder %s820_s5, %s665_s4  ;;  %p669_p0 = scmp.lt.u32.totalorder %s665_s4, %s820_s5 }
 0x216   :  { %p671_p1 = pnand %p669_p0, %p666_p13 }
 0x218   :  { %674 = shalt.err (!%p671_p1)
}
 0x219   :  { %458 = dma.vmem_to_hbm [thread:$0]  %s456_s2, 128, %s820_s5, [#allocation4]  }
 0x21a   :  { %677 = dma.done.wait [#allocation4], 128  }
 0x21b   :  { %678 = vsyncadd [#allocation4], 4294967168 }
 0x21c   :  { %462 = vsyncpa [#allocation3], 1 }
 0x21d   :  { %463 = vsyncpa [#allocation4], 1 }

</bundles_post_ra>
